<compile_context>
chip_gen: v5e
topology: v5e:2x2
jax: 0.10.0
libtpu: 0.0.40
codegen_flags: <defaults>
</compile_context>

<pallas_src>
import functools

import numpy as np
import jax
import jax.numpy as jnp
from jax import lax
from jax.experimental import pallas as pl
from jax.experimental.pallas import tpu as pltpu

_LANES = 128


def _vmem_capacity_bytes():
    """Physical per-core VMEM; falls back to the most constrained gen (v7x)."""
    try:
        return int(pltpu.get_tpu_info().vmem_capacity_bytes)
    except Exception:
        return 64 * 1024 * 1024


def _dice_stats_kernel(pred_ref, target_ref, out_ref, *,
                       apply_sigmoid, group, acc_sub, s_valid, needs_mask):
    """Process one (R_blk, s_tile, 128) block.

    out_ref block: (2, R_blk, acc_sub, 128) f32, resident across the spatial
    grid axis.  Stat 0 accumulates sig*target, stat 1 accumulates sig+target;
    the final (acc_sub, 128) reduce is done once in the wrapper.
    """
    n = pl.program_id(1)

    @pl.when(n == 0)
    def _init():
        out_ref[...] = jnp.zeros_like(out_ref)

    x = pred_ref[...].astype(jnp.float32)      # (R_blk, s_tile, 128), on-chip cast
    t = target_ref[...].astype(jnp.float32)

    if apply_sigmoid:
        # sigmoid(x) == 0.5*(tanh(0.5*x) + 1): one EUP op instead of exp+recip.
        x = 0.5 * jnp.tanh(0.5 * x) + 0.5

    if needs_mask:
        # Ragged last spatial block: zero BOTH streams past the valid extent
        # (zeroing the product alone would let sigmoid() pollute sum(sig)).
        s_tile = x.shape[1]
        s_idx = n * s_tile + lax.broadcasted_iota(jnp.int32, x.shape, 1)
        valid = s_idx < s_valid
        x = jnp.where(valid, x, 0.0)
        t = jnp.where(valid, t, 0.0)

    prod = x * t
    tot = x + t
    if group > 1:
        r_blk, s_tile, lanes = prod.shape
        # Sublane-tile-preserving split of the sublane axis: the axis=1 sum is
        # pure lockstep vreg adds (no XLU cross-sublane reduce, no relayout).
        prod = prod.reshape(r_blk, group, acc_sub, lanes).sum(axis=1)
        tot = tot.reshape(r_blk, group, acc_sub, lanes).sum(axis=1)
    out_ref[0] += prod
    out_ref[1] += tot


def _dice_stats_pallas(pred3, target3, *, apply_sigmoid):
    """pred3/target3: (R, S, 128) in native dtypes. Returns (inter, total), (R,) f32."""
    R, S, lanes = pred3.shape
    assert lanes == _LANES
    p_item = jnp.dtype(pred3.dtype).itemsize
    t_item = jnp.dtype(target3.dtype).itemsize
    itemsize = max(p_item, t_item)

    # Generation-aware VMEM budget: 48 MiB limit on v7x, 96 MiB on v5e/v6e, and
    # ~1-4 MiB per input per pipeline buffer (measured HBM-roofline sweet spot).
    vmem_cap = _vmem_capacity_bytes()
    vmem_limit = min(vmem_cap * 3 // 4, 96 * 1024 * 1024)
    blk_budget = max(1 << 20, min(4 << 20, vmem_cap // 16))

    # Block the row axis (B*C): keeps the block footprint bounded for any R and
    # gives v7x a "parallel" axis to shard across its two TensorCores.
    r_blk = R if R <= 256 else 256
    grid_r = pl.cdiv(R, r_blk)

    # Sublane tile of the folded spatial axis, sized from the byte budget.
    sub_mult = 8 if itemsize >= 4 else (16 if itemsize == 2 else 32)
    s_budget = max(1, blk_budget // (r_blk * _LANES * itemsize))
    if S <= s_budget and (S % 8 == 0 or S <= 8):
        s_tile = S                      # whole spatial extent in one block
    else:
        s_tile = min((S // sub_mult) * sub_mult,
                     max(sub_mult, (s_budget // sub_mult) * sub_mult))
        if s_tile <= 0 or s_tile >= S:
            s_tile = S                  # full-dim block is always legal
    grid_n = pl.cdiv(S, s_tile)
    needs_mask = (S % s_tile) != 0      # ragged last spatial block -> mask in-kernel

    if s_tile % 8 == 0:
        acc_sub, group = 8, s_tile // 8
    else:                               # tiny S (< 8 sublanes): accumulate whole tile
        acc_sub, group = s_tile, 1

    kernel = functools.partial(
        _dice_stats_kernel, apply_sigmoid=apply_sigmoid, group=group,
        acc_sub=acc_sub, s_valid=S, needs_mask=needs_mask)

    out = pl.pallas_call(
        kernel,
        out_shape=jax.ShapeDtypeStruct((2, R, acc_sub, _LANES), jnp.float32),
        grid=(grid_r, grid_n),
        in_specs=[pl.BlockSpec((r_blk, s_tile, _LANES), lambda r, n: (r, n, 0)),
                  pl.BlockSpec((r_blk, s_tile, _LANES), lambda r, n: (r, n, 0))],
        out_specs=pl.BlockSpec((2, r_blk, acc_sub, _LANES),
                               lambda r, n: (0, r, 0, 0)),
        compiler_params=pltpu.CompilerParams(
            dimension_semantics=("parallel", "arbitrary"),
            vmem_limit_bytes=vmem_limit),
        cost_estimate=pl.CostEstimate(
            flops=6 * R * S * _LANES,
            transcendentals=(R * S * _LANES) if apply_sigmoid else 0,
            bytes_accessed=R * S * _LANES * (p_item + t_item)
            + 2 * R * acc_sub * _LANES * 4),
    )(pred3, target3)

    stats = jnp.sum(out, axis=(2, 3))   # tiny finalize: (2, R)
    return stats[0], stats[1]


def _dice_stats_jax(pred2d, target2d, *, apply_sigmoid):
    """Plain-JAX stats for tiny / ragged-tail slabs."""
    p = pred2d.astype(jnp.float32)
    t = target2d.astype(jnp.float32)
    s = jax.nn.sigmoid(p) if apply_sigmoid else p
    return jnp.sum(s * t, axis=-1), jnp.sum(s + t, axis=-1)


def dice_loss(pred, target, *, smooth=1e-6, weight=None):
    """JAX/Pallas equivalent of DiceLoss.forward. pred/target: (B, C, H, W).

    Narrow dtypes (bool/int8/bf16/f16) are streamed as-is and cast to f32
    on-chip, reducing HBM traffic versus f32 inputs.
    """
    B, C, H, W = pred.shape
    R, N = B * C, H * W

    apply_sigmoid = pred.dtype != jnp.bool_
    # Bool tensors can't be streamed as i1 refs; re-encode as 1-byte uint8
    # (4x cheaper than a wrapper-side f32 copy) and convert on-chip.
    if pred.dtype == jnp.bool_:
        pred = pred.astype(jnp.uint8)
    if target.dtype == jnp.bool_:
        target = target.astype(jnp.uint8)

    pred2d = pred.reshape(R, N)
    target2d = target.reshape(R, N)

    n_main = (N // _LANES) * _LANES
    if n_main == 0:
        # Fewer than 128 pixels per (b, c): not worth a kernel launch.
        inter, total = _dice_stats_jax(pred2d, target2d, apply_sigmoid=apply_sigmoid)
    else:
        tail = None
        if n_main < N:
            # Uncommon non-multiple-of-128 spatial size: the <128-px tail is
            # handled in plain JAX so the kernel never sees padded inputs.
            tail = _dice_stats_jax(pred2d[:, n_main:], target2d[:, n_main:],
                                   apply_sigmoid=apply_sigmoid)
            pred2d = pred2d[:, :n_main]
            target2d = target2d[:, :n_main]
        pred3 = pred2d.reshape(R, n_main // _LANES, _LANES)       # free reshape
        target3 = target2d.reshape(R, n_main // _LANES, _LANES)
        inter, total = _dice_stats_pallas(pred3, target3, apply_sigmoid=apply_sigmoid)
        if tail is not None:
            inter = inter + tail[0]
            total = total + tail[1]

    dice = (2.0 * inter + smooth) / (total + smooth)              # (R,)
    dice = dice.reshape(B, C)
    if weight is not None:
        dice = dice * jnp.asarray(weight, dice.dtype)
    return 1.0 - jnp.mean(dice)


if __name__ == "__main__":
    key = jax.random.PRNGKey(0)
    k1, k2 = jax.random.split(key)

    B, C, H, W = 2, 4, 16, 16
    pred = jax.random.normal(k1, (B, C, H, W), dtype=jnp.float32)
    target = (jax.random.uniform(k2, (B, C, H, W)) > 0.5).astype(jnp.float32)

    loss = jax.jit(dice_loss)(pred, target)
    loss = jax.block_until_ready(loss)

    # Pure-JAX reference mirroring the torch module.
    sig = jax.nn.sigmoid(pred)
    inter_ref = jnp.sum(sig * target, axis=(2, 3))
    total_ref = jnp.sum(sig, axis=(2, 3)) + jnp.sum(target, axis=(2, 3))
    dice_ref = (2.0 * inter_ref + 1e-6) / (total_ref + 1e-6)
    loss_ref = 1.0 - jnp.mean(dice_ref)

    assert np.isfinite(float(loss)), "non-finite dice loss"
    np.testing.assert_allclose(float(loss), float(loss_ref), rtol=1e-5, atol=1e-6)

    print("KERNEL_OK")
</pallas_src>

<mosaic_0001>
module attributes {stable_mosaic.version = 11 : i64} {
  func.func @_dice_stats_kernel(%arg0: i32, %arg1: i32, %arg2: memref<8x2x128xf32, #tpu.memory_space<vmem>>, %arg3: memref<8x2x128xf32, #tpu.memory_space<vmem>>, %arg4: memref<2x8x2x128xf32, #tpu.memory_space<vmem>>) attributes {dimension_semantics = [#tpu.dimension_semantics<parallel>, #tpu.dimension_semantics<arbitrary>], iteration_bounds = array<i64: 1, 1>, scalar_prefetch = 0 : i64, scratch_operands = 0 : i64, tpu.core_type = #tpu.core_type<tc>, window_params = [{transform_indices = @transform_0, window_bounds = array<i64: 8, 2, 128>}, {transform_indices = @transform_1, window_bounds = array<i64: 8, 2, 128>}, {transform_indices = @transform_2, window_bounds = array<i64: 2, 8, 2, 128>}]} {
    %c0_i32 = arith.constant 0 : i32
    %0 = arith.cmpi eq, %arg1, %c0_i32 : i32
    %1 = arith.extui %0 : i1 to i32
    %c0_i32_0 = arith.constant 0 : i32
    %2 = arith.cmpi ne, %1, %c0_i32_0 : i32
    scf.if %2 {
      %cst_23 = arith.constant 0.000000e+00 : f32
      %26 = vector.broadcast %cst_23 : f32 to vector<2x8x2x128xf32>
      %c0_24 = arith.constant 0 : index
      %c0_25 = arith.constant 0 : index
      %c0_26 = arith.constant 0 : index
      %c0_27 = arith.constant 0 : index
      %27 = vector.load %arg4[%c0_24, %c0_25, %c0_26, %c0_27] : memref<2x8x2x128xf32, #tpu.memory_space<vmem>>, vector<2x8x2x128xf32>
      tpu.vector_store %arg4[%c0_24, %c0_25, %c0_26, %c0_27], %26 {strides = array<i32>} : memref<2x8x2x128xf32, #tpu.memory_space<vmem>>, vector<2x8x2x128xf32>,
    } else {
    }
    %c0 = arith.constant 0 : index
    %c0_1 = arith.constant 0 : index
    %c0_2 = arith.constant 0 : index
    %3 = vector.load %arg2[%c0, %c0_1, %c0_2] : memref<8x2x128xf32, #tpu.memory_space<vmem>>, vector<8x2x128xf32>
    %c0_3 = arith.constant 0 : index
    %c0_4 = arith.constant 0 : index
    %c0_5 = arith.constant 0 : index
    %4 = vector.load %arg3[%c0_3, %c0_4, %c0_5] : memref<8x2x128xf32, #tpu.memory_space<vmem>>, vector<8x2x128xf32>
    %cst = arith.constant 5.000000e-01 : f32
    %5 = vector.broadcast %cst : f32 to vector<8x2x128xf32>
    %6 = arith.mulf %5, %3 : vector<8x2x128xf32>
    %7 = math.tanh %6 : vector<8x2x128xf32>
    %cst_6 = arith.constant 5.000000e-01 : f32
    %8 = vector.broadcast %cst_6 : f32 to vector<8x2x128xf32>
    %9 = arith.mulf %8, %7 : vector<8x2x128xf32>
    %cst_7 = arith.constant 5.000000e-01 : f32
    %10 = vector.broadcast %cst_7 : f32 to vector<8x2x128xf32>
    %11 = arith.addf %9, %10 : vector<8x2x128xf32>
    %12 = arith.mulf %11, %4 : vector<8x2x128xf32>
    %13 = arith.addf %11, %4 : vector<8x2x128xf32>
    %c0_8 = arith.constant 0 : index
    %c0_9 = arith.constant 0 : index
    %c0_10 = arith.constant 0 : index
    %c0_11 = arith.constant 0 : index
    %14 = vector.load %arg4[%c0_8, %c0_9, %c0_10, %c0_11] : memref<2x8x2x128xf32, #tpu.memory_space<vmem>>, vector<1x8x2x128xf32>
    %15 = vector.shape_cast %14 : vector<1x8x2x128xf32> to vector<8x2x128xf32>
    %16 = arith.addf %15, %12 : vector<8x2x128xf32>
    %c0_12 = arith.constant 0 : index
    %c0_13 = arith.constant 0 : index
    %c0_14 = arith.constant 0 : index
    %c0_15 = arith.constant 0 : index
    %17 = vector.load %arg4[%c0_12, %c0_13, %c0_14, %c0_15] : memref<2x8x2x128xf32, #tpu.memory_space<vmem>>, vector<1x8x2x128xf32>
    %18 = vector.shape_cast %17 : vector<1x8x2x128xf32> to vector<8x2x128xf32>
    %19 = vector.shape_cast %16 : vector<8x2x128xf32> to vector<1x8x2x128xf32>
    tpu.vector_store %arg4[%c0_12, %c0_13, %c0_14, %c0_15], %19 {strides = array<i32>} : memref<2x8x2x128xf32, #tpu.memory_space<vmem>>, vector<1x8x2x128xf32>,
    %c1 = arith.constant 1 : index
    %c0_16 = arith.constant 0 : index
    %c0_17 = arith.constant 0 : index
    %c0_18 = arith.constant 0 : index
    %20 = vector.load %arg4[%c1, %c0_16, %c0_17, %c0_18] : memref<2x8x2x128xf32, #tpu.memory_space<vmem>>, vector<1x8x2x128xf32>
    %21 = vector.shape_cast %20 : vector<1x8x2x128xf32> to vector<8x2x128xf32>
    %22 = arith.addf %21, %13 : vector<8x2x128xf32>
    %c1_19 = arith.constant 1 : index
    %c0_20 = arith.constant 0 : index
    %c0_21 = arith.constant 0 : index
    %c0_22 = arith.constant 0 : index
    %23 = vector.load %arg4[%c1_19, %c0_20, %c0_21, %c0_22] : memref<2x8x2x128xf32, #tpu.memory_space<vmem>>, vector<1x8x2x128xf32>
    %24 = vector.shape_cast %23 : vector<1x8x2x128xf32> to vector<8x2x128xf32>
    %25 = vector.shape_cast %22 : vector<8x2x128xf32> to vector<1x8x2x128xf32>
    tpu.vector_store %arg4[%c1_19, %c0_20, %c0_21, %c0_22], %25 {strides = array<i32>} : memref<2x8x2x128xf32, #tpu.memory_space<vmem>>, vector<1x8x2x128xf32>,
    return
  }
  func.func @transform_0(%arg0: i32, %arg1: i32) -> (i32, i32, i32) {
    %c0_i32 = arith.constant 0 : i32
    %c0_i32_0 = arith.constant 0 : i32
    return %arg0, %arg1, %c0_i32 : i32, i32, i32
  }
  func.func @transform_1(%arg0: i32, %arg1: i32) -> (i32, i32, i32) {
    %c0_i32 = arith.constant 0 : i32
    %c0_i32_0 = arith.constant 0 : i32
    return %arg0, %arg1, %c0_i32 : i32, i32, i32
  }
  func.func @transform_2(%arg0: i32, %arg1: i32) -> (i32, i32, i32, i32) {
    %c0_i32 = arith.constant 0 : i32
    %c0_i32_0 = arith.constant 0 : i32
    %c0_i32_1 = arith.constant 0 : i32
    %c0_i32_2 = arith.constant 0 : i32
    return %c0_i32, %arg0, %c0_i32_0, %c0_i32_1 : i32, i32, i32, i32
  }
}

</mosaic_0001>

<bundles_post_ra>
// kernel: dice_loss.1
= control target key start
LH: loop header
LB: loop body
LE: loop exit
PB: predicated region body
PF: predicated region fallthrough
CT: control target
= control target key end

     0   :  { %v181_v0 = vmov 0.0   ;;  %s389_s2 = inlined_call_operand.vmem [shape: f32[2,8,2,128], index: 2, kind: output, shape index: {}]   ;;  %s390_s0 = inlined_call_operand.vmem [shape: f32[8,2,128], index: 0, kind: input, shape index: {}]   ;;  %s391_s1 = inlined_call_operand.vmem [shape: f32[8,2,128], index: 1, kind: input, shape index: {}]  }
   0x1   :  { %15 = vst [vmem:[%s389_s2] sm:$0x3] %v181_v0  ;;  %v31_v1 = vld [vmem:[%s390_s0] sm:$0x3]  ;;  %v32_v3 = vld [vmem:[%s390_s0 + $0x2] sm:$0x3] }
   0x2   :  { %16 = vst [vmem:[%s389_s2 + $0x2] sm:$0x3] %v181_v0  ;;  %v47_v2 = vmul.f32 0.5, %v31_v1  ;;  %v48_v4 = vmul.f32 0.5, %v32_v3  ;;  %v33_v5 = vld [vmem:[%s390_s0 + $0x4] sm:$0x3] }
   0x3   :  { %17 = vst [vmem:[%s389_s2 + $0x4] sm:$0x3] %v181_v0  ;;  %v49_v6 = vmul.f32 0.5, %v33_v5  ;;  %v34_v7 = vld [vmem:[%s390_s0 + $0x6] sm:$0x3] }
   0x4   :  { %18 = vst [vmem:[%s389_s2 + $0x6] sm:$0x3] %v181_v0  ;;  %165 = vtanh.f32 %v47_v2  ;;  %v50_v8 = vmul.f32 0.5, %v34_v7  ;;  %v35_v9 = vld [vmem:[%s390_s0 + $0x8] sm:$0x3] }
   0x5   :  { %19 = vst [vmem:[%s389_s2 + $0x8] sm:$0x3] %v181_v0  ;;  %167 = vtanh.f32 %v48_v4  ;;  %v51_v10 = vmul.f32 0.5, %v35_v9  ;;  %v36_v11 = vld [vmem:[%s390_s0 + $0xa] sm:$0x3] }
   0x6   :  { %20 = vst [vmem:[%s389_s2 + $0xa] sm:$0x3] %v181_v0  ;;  %169 = vtanh.f32 %v49_v6  ;;  %v39_v14 = vld [vmem:[%s391_s1] sm:$0x3]  ;;  %v52_v16 = vmul.f32 0.5, %v36_v11 }
   0x7   :  { %21 = vst [vmem:[%s389_s2 + $0xc] sm:$0x3] %v181_v0  ;;  %171 = vtanh.f32 %v50_v8  ;;  %v40_v17 = vld [vmem:[%s391_s1 + $0x2] sm:$0x3]  ;;  %v41_v22 = vld [vmem:[%s391_s1 + $0x4] sm:$0x3] }
   0x8   :  { %22 = vst [vmem:[%s389_s2 + $0xe] sm:$0x3] %v181_v0  ;;  %173 = vtanh.f32 %v51_v10  ;;  %v95_v21 = vld [vmem:[%s389_s2] sm:$0x3]  ;;  %v42_v26 = vld [vmem:[%s391_s1 + $0x6] sm:$0x3] }
   0x9   :  { %23 = vst [vmem:[%s389_s2 + $0x10] sm:$0x3] %v181_v0  ;;  %175 = vtanh.f32 %v52_v16  ;;  %v37_v27 = vld [vmem:[%s390_s0 + $0xc] sm:$0x3]  ;;  %v96_v29 = vld [vmem:[%s389_s2 + $0x2] sm:$0x3] }
   0xa   :  { %v166_v12 = vpop.eup %165  ;;  %24 = vst [vmem:[%s389_s2 + $0x12] sm:$0x3] %v181_v0  ;;  %v53_v31 = vmul.f32 0.5, %v37_v27  ;;  %v97_v36 = vld [vmem:[%s389_s2 + $0x4] sm:$0x3] }
   0xb   :  { %v168_v13 = vpop.eup %167  ;;  %25 = vst [vmem:[%s389_s2 + $0x14] sm:$0x3] %v181_v0  ;;  %v63_v15 = vmul.f32 0.5, %v166_v12  ;;  %v43_v37 = vld [vmem:[%s391_s1 + $0x8] sm:$0x3] }
   0xc   :  { %26 = vst [vmem:[%s389_s2 + $0x16] sm:$0x3] %v181_v0  ;;  %v64_v18 = vmul.f32 0.5, %v168_v13  ;;  %v170_v19 = vpop.eup %169  ;;  %v98_v41 = vld [vmem:[%s389_s2 + $0x6] sm:$0x3]  ;;  %177 = vtanh.f32 %v53_v31 }
   0xd   :  { %27 = vst [vmem:[%s389_s2 + $0x18] sm:$0x3] %v181_v0  ;;  %v71_v20 = vadd.f32 0.5, %v63_v15  ;;  %v172_v23 = vpop.eup %171  ;;  %v65_v25 = vmul.f32 0.5, %v170_v19  ;;  %v38_v43 = vld [vmem:[%s390_s0 + $0xe] sm:$0x3] }
   0xe   :  { %28 = vst [vmem:[%s389_s2 + $0x1a] sm:$0x3] %v181_v0  ;;  %v72_v24 = vadd.f32 0.5, %v64_v18  ;;  %v66_v30 = vmul.f32 0.5, %v172_v23  ;;  %v174_v33 = vpop.eup %173  ;;  %v99_v46 = vld [vmem:[%s389_s2 + $0x8] sm:$0x3] }
   0xf   :  { %29 = vst [vmem:[%s389_s2 + $0x1c] sm:$0x3] %v181_v0  ;;  %v79_v28 = vmul.f32 %v71_v20, %v39_v14  ;;  %v87_v32 = vadd.f32 %v71_v20, %v39_v14  ;;  %v73_v35 = vadd.f32 0.5, %v65_v25  ;;  %v67_v42 = vmul.f32 0.5, %v174_v33  ;;  %v176_v50 = vpop.eup %175  ;;  %v44_v63 = vld [vmem:[%s391_s1 + $0xa] sm:$0x3] }
  0x10   :  { %30 = vst [vmem:[%s389_s2 + $0x1e] sm:$0x3] %v181_v0  ;;  %v80_v34 = vmul.f32 %v72_v24, %v40_v17  ;;  %v88_v38 = vadd.f32 %v72_v24, %v40_v17  ;;  %v74_v40 = vadd.f32 0.5, %v66_v30  ;;  %v54_v47 = vmul.f32 0.5, %v38_v43  ;;  %v148_v48 = vld [vmem:[%s389_s2 + $0x10] sm:$0x3] }
  0x11   :  { %v103_v39 = vadd.f32 %v95_v21, %v79_v28  ;;  %v81_v45 = vmul.f32 %v73_v35, %v41_v22  ;;  %v89_v49 = vadd.f32 %v73_v35, %v41_v22  ;;  %v75_v52 = vadd.f32 0.5, %v67_v42  ;;  %v149_v54 = vld [vmem:[%s389_s2 + $0x12] sm:$0x3]  ;;  %v100_v6 = vld [vmem:[%s389_s2 + $0xa] sm:$0x3] }
  0x12   :  { %v104_v44 = vadd.f32 %v96_v29, %v80_v34  ;;  %v82_v51 = vmul.f32 %v74_v40, %v42_v26  ;;  %v128_v53 = vadd.f32 %v148_v48, %v87_v32  ;;  %v150_v55 = vld [vmem:[%s389_s2 + $0x14] sm:$0x3]  ;;  %v90_v56 = vadd.f32 %v74_v40, %v42_v26  ;;  %v178_v4 = vpop.eup %177  ;;  %v45_v12 = vld [vmem:[%s391_s1 + $0xc] sm:$0x3]  ;;  %v46_v22 = vld [vmem:[%s391_s1 + $0xe] sm:$0x3] }
  0x13   :  { %111 = vst [vmem:[%s389_s2] sm:$0x3] %v103_v39  ;;  %v105_v57 = vadd.f32 %v97_v36, %v81_v45  ;;  %v68_v58 = vmul.f32 0.5, %v176_v50  ;;  %179 = vtanh.f32 %v54_v47  ;;  %v129_v59 = vadd.f32 %v149_v54, %v88_v38  ;;  %v151_v60 = vld [vmem:[%s389_s2 + $0x16] sm:$0x3]  ;;  %v101_v17 = vld [vmem:[%s389_s2 + $0xc] sm:$0x3] }
  0x14   :  { %112 = vst [vmem:[%s389_s2 + $0x2] sm:$0x3] %v104_v44  ;;  %v106_v61 = vadd.f32 %v98_v41, %v82_v51  ;;  %v83_v62 = vmul.f32 %v75_v52, %v43_v37  ;;  %v130_v1 = vadd.f32 %v150_v55, %v89_v49  ;;  %v91_v2 = vadd.f32 %v75_v52, %v43_v37  ;;  %v152_v3 = vld [vmem:[%s389_s2 + $0x18] sm:$0x3]  ;;  %v102_v26 = vld [vmem:[%s389_s2 + $0xe] sm:$0x3] }
  0x15   :  { %156 = vst [vmem:[%s389_s2 + $0x10] sm:$0x3] %v128_v53  ;;  %v76_v0 = vadd.f32 0.5, %v68_v58  ;;  %v131_v7 = vadd.f32 %v151_v60, %v90_v56  ;;  %v153_v8 = vld [vmem:[%s389_s2 + $0x1a] sm:$0x3]  ;;  %v69_v10 = vmul.f32 0.5, %v178_v4 }
  0x16   :  { %113 = vst [vmem:[%s389_s2 + $0x4] sm:$0x3] %v105_v57  ;;  %v107_v5 = vadd.f32 %v99_v46, %v83_v62  ;;  %v132_v13 = vadd.f32 %v152_v3, %v91_v2  ;;  %v154_v20 = vld [vmem:[%s389_s2 + $0x1c] sm:$0x3] }
  0x17   :  { %114 = vst [vmem:[%s389_s2 + $0x6] sm:$0x3] %v106_v61  ;;  %v84_v9 = vmul.f32 %v76_v0, %v44_v63  ;;  %v92_v11 = vadd.f32 %v76_v0, %v44_v63  ;;  %v77_v16 = vadd.f32 0.5, %v69_v10  ;;  %v155_v28 = vld [vmem:[%s389_s2 + $0x1e] sm:$0x3] }
  0x18   :  { %157 = vst [vmem:[%s389_s2 + $0x12] sm:$0x3] %v129_v59 }
  0x19   :  { %115 = vst [vmem:[%s389_s2 + $0x8] sm:$0x3] %v107_v5  ;;  %v180_v14 = vpop.eup %179  ;;  %v108_v15 = vadd.f32 %v100_v6, %v84_v9  ;;  %v133_v18 = vadd.f32 %v153_v8, %v92_v11  ;;  %v85_v21 = vmul.f32 %v77_v16, %v45_v12  ;;  %v93_v23 = vadd.f32 %v77_v16, %v45_v12 }
  0x1a   :  { %158 = vst [vmem:[%s389_s2 + $0x14] sm:$0x3] %v130_v1  ;;  %v70_v19 = vmul.f32 0.5, %v180_v14 }
  0x1b   :  { %159 = vst [vmem:[%s389_s2 + $0x16] sm:$0x3] %v131_v7  ;;  %v109_v25 = vadd.f32 %v101_v17, %v85_v21  ;;  %v134_v27 = vadd.f32 %v154_v20, %v93_v23 }
  0x1c   :  { %116 = vst [vmem:[%s389_s2 + $0xa] sm:$0x3] %v108_v15  ;;  %v78_v24 = vadd.f32 0.5, %v70_v19 }
  0x1d   :  { %160 = vst [vmem:[%s389_s2 + $0x18] sm:$0x3] %v132_v13 }
  0x1e   :  { %161 = vst [vmem:[%s389_s2 + $0x1a] sm:$0x3] %v133_v18  ;;  %v86_v29 = vmul.f32 %v78_v24, %v46_v22  ;;  %v94_v30 = vadd.f32 %v78_v24, %v46_v22 }
  0x1f   :  { %117 = vst [vmem:[%s389_s2 + $0xc] sm:$0x3] %v109_v25 }
  0x20   :  { %v110_v31 = vadd.f32 %v102_v26, %v86_v29  ;;  %162 = vst [vmem:[%s389_s2 + $0x1c] sm:$0x3] %v134_v27  ;;  %v135_v32 = vadd.f32 %v155_v28, %v94_v30 }
  0x22   :  { %118 = vst [vmem:[%s389_s2 + $0xe] sm:$0x3] %v110_v31 }
  0x23   :  { %163 = vst [vmem:[%s389_s2 + $0x1e] sm:$0x3] %v135_v32 }

</bundles_post_ra>
